<compile_context>
chip_gen: v7x
topology: tpu7x:2x2x1
jax: 0.10.0
libtpu: 0.0.40
codegen_flags: <defaults>
</compile_context>

<pallas_src>
import functools

import jax
import jax.numpy as jnp
from jax.experimental import pallas as pl
from jax.experimental.pallas import tpu as pltpu


def _round_up(n, m):
    return (n + m - 1) // m * m


def _custom_bn_kernel(alpha_ref, x_ref, out_ref, bmean_ref, bvar_ref,
                      *, eps, weight, bias, inv_l, inv_bl):
    """One channel tile in native layout: x block is (B, Ct, L)."""
    x = x_ref[...]                                   # (B, Ct, L), original dtype
    alpha = alpha_ref[0]                             # sigmoid already applied
    one_m_alpha = 1.0 - alpha

    # --- single-pass moments, f32 accumulation, no full-block f32 copy -----
    s1 = jnp.sum(x, axis=-1, keepdims=True, dtype=jnp.float32)            # (B, Ct, 1)
    s2 = jnp.sum(jnp.square(x.astype(jnp.float32)), axis=-1, keepdims=True)

    inst_mean = s1 * inv_l                                                 # (B, Ct, 1)
    inst_var = jnp.maximum(s2 * inv_l - inst_mean * inst_mean, 0.0)

    bs1 = jnp.sum(s1, axis=0, keepdims=True)                               # (1, Ct, 1)
    bs2 = jnp.sum(s2, axis=0, keepdims=True)
    batch_mean = bs1 * inv_bl
    batch_var = jnp.maximum(bs2 * inv_bl - batch_mean * batch_mean, 0.0)

    # --- blended mean / var -------------------------------------------------
    mean = alpha * batch_mean + one_m_alpha * inst_mean                    # (B, Ct, 1)
    diff = batch_mean - inst_mean
    var = (alpha * batch_var
           + one_m_alpha * inst_var
           + (alpha * one_m_alpha) * diff * diff)

    # rsqrt on the small stats tensor (EUP); fused scale/shift so the
    # full-tensor path is one multiply + one add per element.
    inv_std = jax.lax.rsqrt(var + eps)
    scale = weight * inv_std                                               # (B, Ct, 1)
    shift = bias - mean * scale

    if x.dtype == jnp.bfloat16:
        # keep the per-element FMA in packed bf16 vregs on v6e/v7x
        scale = scale.astype(jnp.bfloat16)
        shift = shift.astype(jnp.bfloat16)

    out_ref[...] = (x * scale + shift).astype(out_ref.dtype)
    bmean_ref[...] = batch_mean.astype(bmean_ref.dtype)                    # (1, Ct, 1)
    bvar_ref[...] = batch_var.astype(bvar_ref.dtype)


def _vmem_capacity_bytes():
    try:
        return int(pltpu.get_tpu_info().vmem_capacity_bytes)
    except Exception:
        return 64 * 1024 * 1024   # conservative default (v7x per-TC VMEM)


def _choose_channel_tile(B, C, L, in_bytes, out_bytes, block_budget):
    """Channel tile: multiple of 8 (sublane), divides padded C, fits VMEM budget,
    and leaves enough grid steps for pipelining / megacore sharding."""
    c8 = _round_up(C, 8)
    per_c = B * L * (in_bytes + out_bytes) * 2        # double-buffered in + out block
    ct_cap = max(8, int(block_budget // max(per_c, 1)) // 8 * 8)
    if c8 >= 64:
        ct_cap = min(ct_cap, max(8, (c8 // 8) // 8 * 8))    # >= 8 grid steps
    elif c8 >= 16:
        ct_cap = min(ct_cap, max(8, (c8 // 2) // 8 * 8))    # >= 2 grid steps
    ct_cap = min(ct_cap, c8)
    ct = ct_cap
    while c8 % ct:
        ct -= 8
    return ct, c8
    # TODO(synk): if B*L is so large that even an 8-channel double-buffered block
    # exceeds the VMEM budget, a B-tiled / two-pass (stats + normalize) variant
    # with scratch accumulation is needed; not implemented here.


def custom_batch_norm(x, alpha_param, *, eps=1e-6, weight=1.0, bias=0.0):
    """x: (B, C, L) float; alpha_param: (1,) float32 (raw, pre-sigmoid).

    Returns (out, batch_mean, batch_var) matching the PyTorch module's
    default path: out (B, C, L), stats (1, C, 1).
    """
    B, C, L = x.shape

    vmem_cap = _vmem_capacity_bytes()
    vmem_limit = min(vmem_cap * 3 // 4, 64 * 1024 * 1024)      # 48 MiB on v7x, 64 on v5e/v6e
    block_budget = max(vmem_limit - 8 * 1024 * 1024, 4 * 1024 * 1024)

    itemsize = jnp.dtype(x.dtype).itemsize
    ct, c_pad = _choose_channel_tile(B, C, L, itemsize, itemsize, block_budget)

    # Pad channels to the tile-aligned size (no-op when C already aligned).
    x_k = x if c_pad == C else jnp.pad(x, ((0, 0), (0, c_pad - C), (0, 0)))

    # torch.sigmoid(self.alpha) — computed once here (tiny scalar op).
    alpha = jax.nn.sigmoid(alpha_param.astype(jnp.float32))     # (1,)

    kernel = functools.partial(
        _custom_bn_kernel,
        eps=float(eps), weight=float(weight), bias=float(bias),
        inv_l=1.0 / L, inv_bl=1.0 / (B * L),
    )

    grid = (c_pad // ct,)
    out_k, bmean_k, bvar_k = pl.pallas_call(
        kernel,
        grid=grid,
        out_shape=(
            jax.ShapeDtypeStruct((B, c_pad, L), x.dtype),
            jax.ShapeDtypeStruct((1, c_pad, 1), jnp.float32),
            jax.ShapeDtypeStruct((1, c_pad, 1), jnp.float32),
        ),
        in_specs=[
            pl.BlockSpec(memory_space=pltpu.MemorySpace.SMEM),       # sigmoid(alpha), (1,)
            # NOTE: could add pipeline_mode=pl.Buffered(3) here after a VMEM sweep.
            pl.BlockSpec((B, ct, L), lambda c: (0, c, 0)),           # x, native layout
        ],
        out_specs=(
            pl.BlockSpec((B, ct, L), lambda c: (0, c, 0)),           # out
            pl.BlockSpec((1, ct, 1), lambda c: (0, c, 0)),           # batch_mean
            pl.BlockSpec((1, ct, 1), lambda c: (0, c, 0)),           # batch_var
        ),
        compiler_params=pltpu.CompilerParams(
            dimension_semantics=("parallel",),
            vmem_limit_bytes=int(vmem_limit),
        ),
    )(alpha, x_k)

    if c_pad != C:
        out = out_k[:, :C, :]
        batch_mean = bmean_k[:, :C, :]
        batch_var = bvar_k[:, :C, :]
    else:
        out, batch_mean, batch_var = out_k, bmean_k, bvar_k
    return out, batch_mean, batch_var


def _reference(x, alpha_param, eps=1e-6, weight=1.0, bias=0.0):
    """Pure-JAX reference mirroring the PyTorch forward (default path)."""
    alpha = jax.nn.sigmoid(alpha_param[0])
    batch_mean = jnp.mean(x, axis=(0, 2), keepdims=True)
    batch_var = jnp.mean((x - batch_mean) ** 2, axis=(0, 2), keepdims=True)
    inst_mean = jnp.mean(x, axis=-1, keepdims=True)
    inst_var = jnp.mean((x - inst_mean) ** 2, axis=-1, keepdims=True)
    mean = alpha * batch_mean + (1 - alpha) * inst_mean
    var = (alpha * batch_var + (1 - alpha) * inst_var
           + alpha * (1 - alpha) * (batch_mean - inst_mean) ** 2)
    out = weight * (x - mean) / jnp.sqrt(var + eps) + bias
    return out, batch_mean, batch_var


if __name__ == "__main__":
    key = jax.random.PRNGKey(0)
    B, C, L = 2, 4, 16           # small test shape; the kernel targets large B*C*L
    x = jax.random.normal(key, (B, C, L), dtype=jnp.float32)

    # nn.Parameter(torch.Tensor([0.0])) -> deterministic init: zeros of shape (1,)
    alpha_param = jnp.zeros((1,), dtype=jnp.float32)

    out, bmean, bvar = custom_batch_norm(x, alpha_param)
    jax.block_until_ready((out, bmean, bvar))

    ref_out, ref_bmean, ref_bvar = _reference(x, alpha_param)
    assert jnp.allclose(out, ref_out, atol=1e-5, rtol=1e-5)
    assert jnp.allclose(bmean, ref_bmean, atol=1e-5, rtol=1e-5)
    assert jnp.allclose(bvar, ref_bvar, atol=1e-5, rtol=1e-5)

    print("KERNEL_OK")
</pallas_src>

<mosaic_0001>
module attributes {stable_mosaic.version = 11 : i64} {
  func.func @_custom_bn_kernel(%arg0: i32, %arg1: memref<1xf32, #tpu.memory_space<smem>>, %arg2: memref<2x8x16xf32, #tpu.memory_space<vmem>>, %arg3: memref<2x8x16xf32, #tpu.memory_space<vmem>>, %arg4: memref<1x8x1xf32, #tpu.memory_space<vmem>>, %arg5: memref<1x8x1xf32, #tpu.memory_space<vmem>>) attributes {dimension_semantics = [#tpu.dimension_semantics<parallel>], iteration_bounds = array<i64: 1>, scalar_prefetch = 0 : i64, scratch_operands = 0 : i64, tpu.core_type = #tpu.core_type<tc>, window_params = [{transform_indices = @transform_0, window_bounds = array<i64: 1>}, {transform_indices = @transform_1, window_bounds = array<i64: 2, 8, 16>}, {transform_indices = @transform_2, window_bounds = array<i64: 2, 8, 16>}, {transform_indices = @transform_3, window_bounds = array<i64: 1, 8, 1>}, {transform_indices = @transform_4, window_bounds = array<i64: 1, 8, 1>}]} {
    %c0 = arith.constant 0 : index
    %c0_0 = arith.constant 0 : index
    %c0_1 = arith.constant 0 : index
    %0 = vector.load %arg2[%c0, %c0_0, %c0_1] : memref<2x8x16xf32, #tpu.memory_space<vmem>>, vector<2x8x16xf32>
    %c0_2 = arith.constant 0 : index
    %1 = memref.load %arg1[%c0_2] : memref<1xf32, #tpu.memory_space<smem>>
    %cst = arith.constant 1.000000e+00 : f32
    %2 = arith.subf %cst, %1 : f32
    %cst_3 = arith.constant dense<0.000000e+00> : vector<2x8xf32>
    %3 = vector.multi_reduction <add>, %0, %cst_3 [2] : vector<2x8x16xf32> to vector<2x8xf32>
    %4 = vector.shape_cast %3 : vector<2x8xf32> to vector<2x8x1xf32>
    %5 = arith.mulf %0, %0 : vector<2x8x16xf32>
    %cst_4 = arith.constant dense<0.000000e+00> : vector<2x8xf32>
    %6 = vector.multi_reduction <add>, %5, %cst_4 [2] : vector<2x8x16xf32> to vector<2x8xf32>
    %7 = vector.shape_cast %6 : vector<2x8xf32> to vector<2x8x1xf32>
    %cst_5 = arith.constant 6.250000e-02 : f32
    %8 = vector.broadcast %cst_5 : f32 to vector<2x8x1xf32>
    %9 = arith.mulf %4, %8 : vector<2x8x1xf32>
    %cst_6 = arith.constant 6.250000e-02 : f32
    %10 = vector.broadcast %cst_6 : f32 to vector<2x8x1xf32>
    %11 = arith.mulf %7, %10 : vector<2x8x1xf32>
    %12 = arith.mulf %9, %9 : vector<2x8x1xf32>
    %13 = arith.subf %11, %12 : vector<2x8x1xf32>
    %cst_7 = arith.constant 0.000000e+00 : f32
    %14 = vector.broadcast %cst_7 : f32 to vector<2x8x1xf32>
    %15 = arith.maximumf %13, %14 : vector<2x8x1xf32>
    %cst_8 = arith.constant dense<0.000000e+00> : vector<8x1xf32>
    %16 = vector.multi_reduction <add>, %4, %cst_8 [0] : vector<2x8x1xf32> to vector<8x1xf32>
    %17 = vector.shape_cast %16 : vector<8x1xf32> to vector<1x8x1xf32>
    %cst_9 = arith.constant dense<0.000000e+00> : vector<8x1xf32>
    %18 = vector.multi_reduction <add>, %7, %cst_9 [0] : vector<2x8x1xf32> to vector<8x1xf32>
    %19 = vector.shape_cast %18 : vector<8x1xf32> to vector<1x8x1xf32>
    %cst_10 = arith.constant 3.125000e-02 : f32
    %20 = vector.broadcast %cst_10 : f32 to vector<1x8x1xf32>
    %21 = arith.mulf %17, %20 : vector<1x8x1xf32>
    %cst_11 = arith.constant 3.125000e-02 : f32
    %22 = vector.broadcast %cst_11 : f32 to vector<1x8x1xf32>
    %23 = arith.mulf %19, %22 : vector<1x8x1xf32>
    %24 = arith.mulf %21, %21 : vector<1x8x1xf32>
    %25 = arith.subf %23, %24 : vector<1x8x1xf32>
    %cst_12 = arith.constant 0.000000e+00 : f32
    %26 = vector.broadcast %cst_12 : f32 to vector<1x8x1xf32>
    %27 = arith.maximumf %25, %26 : vector<1x8x1xf32>
    %28 = vector.broadcast %1 : f32 to vector<1x8x1xf32>
    %29 = arith.mulf %28, %21 : vector<1x8x1xf32>
    %30 = vector.broadcast %2 : f32 to vector<2x8x1xf32>
    %31 = arith.mulf %30, %9 : vector<2x8x1xf32>
    %32 = vector.broadcast %29 : vector<1x8x1xf32> to vector<2x8x1xf32>
    %33 = arith.addf %32, %31 : vector<2x8x1xf32>
    %34 = vector.broadcast %21 : vector<1x8x1xf32> to vector<2x8x1xf32>
    %35 = arith.subf %34, %9 : vector<2x8x1xf32>
    %36 = vector.broadcast %1 : f32 to vector<1x8x1xf32>
    %37 = arith.mulf %36, %27 : vector<1x8x1xf32>
    %38 = vector.broadcast %2 : f32 to vector<2x8x1xf32>
    %39 = arith.mulf %38, %15 : vector<2x8x1xf32>
    %40 = vector.broadcast %37 : vector<1x8x1xf32> to vector<2x8x1xf32>
    %41 = arith.addf %40, %39 : vector<2x8x1xf32>
    %42 = arith.mulf %1, %2 : f32
    %43 = vector.broadcast %42 : f32 to vector<2x8x1xf32>
    %44 = arith.mulf %43, %35 : vector<2x8x1xf32>
    %45 = arith.mulf %44, %35 : vector<2x8x1xf32>
    %46 = arith.addf %41, %45 : vector<2x8x1xf32>
    %cst_13 = arith.constant 9.99999997E-7 : f32
    %47 = vector.broadcast %cst_13 : f32 to vector<2x8x1xf32>
    %48 = arith.addf %46, %47 : vector<2x8x1xf32>
    %49 = math.rsqrt %48 : vector<2x8x1xf32>
    %cst_14 = arith.constant 1.000000e+00 : f32
    %50 = vector.broadcast %cst_14 : f32 to vector<2x8x1xf32>
    %51 = arith.mulf %50, %49 : vector<2x8x1xf32>
    %52 = arith.mulf %33, %51 : vector<2x8x1xf32>
    %cst_15 = arith.constant 0.000000e+00 : f32
    %53 = vector.broadcast %cst_15 : f32 to vector<2x8x1xf32>
    %54 = arith.subf %53, %52 : vector<2x8x1xf32>
    %55 = vector.broadcast %51 : vector<2x8x1xf32> to vector<2x8x16xf32>
    %56 = arith.mulf %0, %55 : vector<2x8x16xf32>
    %57 = vector.broadcast %54 : vector<2x8x1xf32> to vector<2x8x16xf32>
    %58 = arith.addf %56, %57 : vector<2x8x16xf32>
    %c0_16 = arith.constant 0 : index
    %c0_17 = arith.constant 0 : index
    %c0_18 = arith.constant 0 : index
    %59 = vector.load %arg3[%c0_16, %c0_17, %c0_18] : memref<2x8x16xf32, #tpu.memory_space<vmem>>, vector<2x8x16xf32>
    tpu.vector_store %arg3[%c0_16, %c0_17, %c0_18], %58 {strides = array<i32>} : memref<2x8x16xf32, #tpu.memory_space<vmem>>, vector<2x8x16xf32>,
    %c0_19 = arith.constant 0 : index
    %c0_20 = arith.constant 0 : index
    %c0_21 = arith.constant 0 : index
    %60 = vector.load %arg4[%c0_19, %c0_20, %c0_21] : memref<1x8x1xf32, #tpu.memory_space<vmem>>, vector<1x8x1xf32>
    tpu.vector_store %arg4[%c0_19, %c0_20, %c0_21], %21 {strides = array<i32>} : memref<1x8x1xf32, #tpu.memory_space<vmem>>, vector<1x8x1xf32>,
    %c0_22 = arith.constant 0 : index
    %c0_23 = arith.constant 0 : index
    %c0_24 = arith.constant 0 : index
    %61 = vector.load %arg5[%c0_22, %c0_23, %c0_24] : memref<1x8x1xf32, #tpu.memory_space<vmem>>, vector<1x8x1xf32>
    tpu.vector_store %arg5[%c0_22, %c0_23, %c0_24], %27 {strides = array<i32>} : memref<1x8x1xf32, #tpu.memory_space<vmem>>, vector<1x8x1xf32>,
    return
  }
  func.func @transform_0(%arg0: i32) -> i32 {
    %c0_i32 = arith.constant 0 : i32
    %c0_i32_0 = arith.constant 0 : i32
    return %c0_i32 : i32
  }
  func.func @transform_1(%arg0: i32) -> (i32, i32, i32) {
    %c0_i32 = arith.constant 0 : i32
    %c0_i32_0 = arith.constant 0 : i32
    %c0_i32_1 = arith.constant 0 : i32
    return %c0_i32, %arg0, %c0_i32_0 : i32, i32, i32
  }
  func.func @transform_2(%arg0: i32) -> (i32, i32, i32) {
    %c0_i32 = arith.constant 0 : i32
    %c0_i32_0 = arith.constant 0 : i32
    %c0_i32_1 = arith.constant 0 : i32
    return %c0_i32, %arg0, %c0_i32_0 : i32, i32, i32
  }
  func.func @transform_3(%arg0: i32) -> (i32, i32, i32) {
    %c0_i32 = arith.constant 0 : i32
    %c0_i32_0 = arith.constant 0 : i32
    %c0_i32_1 = arith.constant 0 : i32
    return %c0_i32, %arg0, %c0_i32_0 : i32, i32, i32
  }
  func.func @transform_4(%arg0: i32) -> (i32, i32, i32) {
    %c0_i32 = arith.constant 0 : i32
    %c0_i32_0 = arith.constant 0 : i32
    %c0_i32_1 = arith.constant 0 : i32
    return %c0_i32, %arg0, %c0_i32_0 : i32, i32, i32
  }
}

</mosaic_0001>

<bundles_post_ra>
// kernel: tpu_custom_call.1
= control target key start
LH: loop header
LB: loop body
LE: loop exit
PB: predicated region body
PF: predicated region fallthrough
CT: control target
= control target key end

     0   :  { %11 = vsyncpa [#allocation4], 0  ;;  %s280_s0 = inlined_call_operand.<no memory space> [shape: f32[1], index: 0, kind: input, shape index: {}]   ;;  %s281_s1 = inlined_call_operand.hbm [shape: f32[2,8,16], index: 1, kind: input, shape index: {}]   ;;  %s282_s2 = inlined_call_operand.hbm [shape: f32[2,8,16], index: 2, kind: output, shape index: {0}]   ;;  %s283_s3 = inlined_call_operand.vmem [shape: f32[1,8,1], index: 3, kind: output, shape index: {1}]   ;;  %s284_s4 = inlined_call_operand.vmem [shape: f32[1,8,1], index: 4, kind: output, shape index: {2}]  }
   0x1   :  { %12 = vsyncpa [#allocation5], 0  ;;  %s186_s15 = smov [#allocation3]   ;;  %s138_s19 = scalar_lea.hbm %s281_s1, 256 }
   0x2   :  { %s20_s16 = sshll.u32 %s186_s15, 4  ;;  %p139_p0 = scmp.ne.s32.totalorder %s281_s1, %s138_s19  ;;  %s21_s16 = int_to_ptr.vmem [resolvable:$true] %s20_s16 }
   0x3   :  { %p142_p1 = scmp.lt.u32.totalorder %s138_s19, %s281_s1 }
   0x5   :  { %p144_p2 = pnand %p142_p1, %p139_p0 }
   0x7   :  { %147 = shalt.err (!%p144_p2)
}
   0x8   :  { %s148_s24 = scalar_lea.vmem %s21_s16, 256  ;;  %p153_p4 = scmp.lt.s32.totalorder %s21_s16, %s21_s16 }
   0x9   :  { %p149_p3 = scmp.ne.s32.totalorder %s21_s16, %s148_s24  ;;  %p154_p5 = scmp.lt.s32.totalorder %s148_s24, %s148_s24 }
   0xb   :  { %p155_p6 = por %p154_p5, %p153_p4 }
   0xd   :  { %p156_p7 = pnand %p155_p6, %p149_p3 }
   0xf   :  { %159 = shalt.err (!%p156_p7)
}
  0x10   :  { %s187_s25 = smov 128   ;;  %s188_s26 = smov 8  }
  0x11   :  { %26 = dma.hbm_to_vmem [thread:$0]  %s281_s1, 256, %s21_s16, [#allocation4], %s187_s25, %s187_s25, %s188_s26  }
  0x12   :  { %182 = dma.done.wait [#allocation4], 256  }
  0x13   :  { %183 = vsyncadd [#allocation4], 4294967040  ;;  %vm34_vm0 = vcmask 130048   ;;  %v230_v0 = vld [vmem:[#allocation3] sm:$0xff]  ;;  %v232_v1 = vld [vmem:[#allocation3 + $0x8] sm:$0xff]  ;;  %s33_s30 = ssub.f32 1.0, %s280_s0  ;;  %v66_v35 = vstv %s280_s0 }
  0x14   :  { %v35_v2 = vsel %vm34_vm0, %v230_v0, 0.0  ;;  %v41_v3 = vmul.f32 %v230_v0, %v230_v0  ;;  %v42_v4 = vmul.f32 %v232_v1, %v232_v1  ;;  %v38_v6 = vsel %vm34_vm0, %v232_v1, 0.0 }
  0x15   :  { %36 = vadd.xlane.f32.xlu0 %v35_v2  ;;  %vm102_vm1 = vcmask 7168   ;;  %s80_s7 = smul.f32 %s33_s30, %s280_s0  ;;  %v68_v34 = vstv %s33_s30  ;;  %s189_s0 = smov [#allocation6]  }
  0x16   :  { %v43_v5 = vsel %vm34_vm0, %v41_v3, 0.0  ;;  %v46_v7 = vsel %vm34_vm0, %v42_v4, 0.0 }
  0x17   :  { %44 = vadd.xlane.f32.xlu1 %v43_v5  ;;  %v81_v27 = vstv %s80_s7 }
  0x19   :  { %39 = vadd.xlane.f32.xlu0 %v38_v6 }
  0x1b   :  { %47 = vadd.xlane.f32.xlu1 %v46_v7 }
  0xa2   :  { %v37_v8 = vpop.xlane.xlu0 %36 }
  0xa3   :  { %v49_v9 = vmul.f32 0.0625, %v37_v8 }
  0xa4   :  { %v45_v10 = vpop.xlane.xlu1 %44 }
  0xa5   :  { %v51_v11 = vmul.f32 0.0625, %v45_v10  ;;  %v53_v12 = vmul.f32 %v49_v9, %v49_v9  ;;  %v69_v48 = vmul.f32 %v68_v34, %v49_v9 }
  0xa6   :  { %v40_v13 = vpop.xlane.xlu0 %39 }
  0xa7   :  { %v50_v14 = vmul.f32 0.0625, %v40_v13  ;;  %v59_v15 = vadd.f32 %v40_v13, %v37_v8  ;;  %v55_v19 = vsub.f32 %v51_v11, %v53_v12 }
  0xa8   :  { %v48_v16 = vpop.xlane.xlu1 %47 }
  0xa9   :  { %v61_v17 = vmul.f32 0.03125, %v59_v15  ;;  %v52_v18 = vmul.f32 0.0625, %v48_v16  ;;  %v54_v20 = vmul.f32 %v50_v14, %v50_v14  ;;  %v60_v21 = vadd.f32 %v48_v16, %v45_v10 }
  0xaa   :  { %v57_v28 = vmax.f32 %v55_v19, 0.0  ;;  %v70_v49 = vmul.f32 %v68_v34, %v50_v14 }
  0xab   :  { %v63_v22 = vmul.f32 %v61_v17, %v61_v17  ;;  %103 = vst.msk [vmem:[%s283_s3] sm:$0xff] %vm102_vm1, %v61_v17  ;;  %v73_v23 = vsub.f32 %v61_v17, %v49_v9  ;;  %v74_v24 = vsub.f32 %v61_v17, %v50_v14  ;;  %v56_v25 = vsub.f32 %v52_v18, %v54_v20 }
  0xac   :  { %v62_v26 = vmul.f32 0.03125, %v60_v21  ;;  %v76_v36 = vmul.f32 %v68_v34, %v57_v28  ;;  %v67_v47 = vmul.f32 %v66_v35, %v61_v17 }
  0xad   :  { %v58_v29 = vmax.f32 %v56_v25, 0.0  ;;  %v82_v31 = vmul.f32 %v81_v27, %v73_v23  ;;  %v83_v32 = vmul.f32 %v81_v27, %v74_v24 }
  0xae   :  { %v64_v30 = vsub.f32 %v62_v26, %v63_v22  ;;  %v71_v50 = vadd.f32 %v69_v48, %v67_v47  ;;  %v72_v52 = vadd.f32 %v70_v49, %v67_v47 }
  0xaf   :  { %v77_v38 = vmul.f32 %v68_v34, %v58_v29  ;;  %v84_v39 = vmul.f32 %v82_v31, %v73_v23  ;;  %v85_v40 = vmul.f32 %v83_v32, %v74_v24 }
  0xb0   :  { %v65_v33 = vmax.f32 %v64_v30, 0.0 }
  0xb2   :  { %v75_v37 = vmul.f32 %v66_v35, %v65_v33  ;;  %104 = vst.msk [vmem:[%s284_s4] sm:$0xff] %vm102_vm1, %v65_v33  ;;  %s110_s4 = sshll.u32 %s189_s0, 4  ;;  %s111_s4 = int_to_ptr.vmem [resolvable:$true] %s110_s4 }
  0xb3   :  { %s160_s13 = scalar_lea.vmem %s111_s4, 256  ;;  %p165_p9 = scmp.lt.s32.totalorder %s111_s4, %s111_s4 }
  0xb4   :  { %v78_v41 = vadd.f32 %v76_v36, %v75_v37  ;;  %v79_v42 = vadd.f32 %v77_v38, %v75_v37  ;;  %p161_p8 = scmp.ne.s32.totalorder %s111_s4, %s160_s13  ;;  %p166_p10 = scmp.lt.s32.totalorder %s160_s13, %s160_s13 }
  0xb6   :  { %v86_v43 = vadd.f32 %v84_v39, %v78_v41  ;;  %v87_v44 = vadd.f32 %v85_v40, %v79_v42  ;;  %p167_p11 = por %p166_p10, %p165_p9 }
  0xb8   :  { %v88_v45 = vadd.f32 1e-06, %v86_v43  ;;  %v89_v46 = vadd.f32 1e-06, %v87_v44  ;;  %p168_p12 = pnand %p167_p11, %p161_p8 }
  0xba   :  { %134 = vrsqrt.f32 %v88_v45 }
  0xbb   :  { %136 = vrsqrt.f32 %v89_v46 }
  0xc4   :  { %v135_v51 = vpop.eup %134 }
  0xc5   :  { %v137_v53 = vpop.eup %136  ;;  %v92_v54 = vmul.f32 %v135_v51, %v71_v50  ;;  %v96_v57 = vmul.f32 %v135_v51, %v230_v0 }
  0xc6   :  { %v93_v55 = vmul.f32 %v137_v53, %v72_v52  ;;  %v97_v59 = vmul.f32 %v137_v53, %v232_v1 }
  0xc7   :  { %v94_v56 = vsub.f32 0.0, %v92_v54 }
  0xc8   :  { %v95_v58 = vsub.f32 0.0, %v93_v55 }
  0xc9   :  { %v98_v60 = vadd.f32 %v96_v57, %v94_v56 }
  0xca   :  { %v99_v61 = vadd.f32 %v97_v59, %v95_v58 }
  0xcb   :  { %100 = vst.msk [vmem:[#allocation6] sm:$0xff] %vm34_vm0, %v98_v60 }
  0xcc   :  { %101 = vst.msk [vmem:[#allocation6 + $0x8] sm:$0xff] %vm34_vm0, %v99_v61 }
  0xcd   :  { %171 = shalt.err (!%p168_p12)
}
  0xce   :  { %s172_s16 = scalar_lea.hbm %s282_s2, 256 }
  0xcf   :  { %p173_p13 = scmp.ne.s32.totalorder %s282_s2, %s172_s16  ;;  %p176_p0 = scmp.lt.u32.totalorder %s172_s16, %s282_s2 }
  0xd1   :  { %p178_p1 = pnand %p176_p0, %p173_p13 }
  0xd3   :  { %181 = shalt.err (!%p178_p1)
}
  0xd4   :  { %116 = dma.vmem_to_hbm [thread:$0]  %s111_s4, 256, %s282_s2, [#allocation5], %s187_s25, %s187_s25, %s188_s26  }
  0xd5   :  { %184 = dma.done.wait [#allocation5], 256  }
  0xd6   :  { %185 = vsyncadd [#allocation5], 4294967040 }
  0xd7   :  { %128 = vsyncpa [#allocation4], 1 }
  0xd8   :  { %129 = vsyncpa [#allocation5], 1 }

</bundles_post_ra>
